<compile_context>
chip_gen: v6e
topology: v6e:2x2x1
jax: 0.10.0
libtpu: 0.0.40
codegen_flags: <defaults>
</compile_context>

<pallas_src>
import jax
import jax.numpy as jnp
from jax.experimental import pallas as pl
from jax.experimental.pallas import tpu as pltpu


def _round_up(a: int, b: int) -> int:
    return (a + b - 1) // b * b


def _fused_matmul_kernel(x_ref, w_ref, b_ref, o_ref, acc_ref):
    # One (i, j, k) grid step of out = x @ w + b with an f32 accumulator.
    @pl.when(pl.program_id(2) == 0)
    def _init():
        acc_ref[...] = jnp.zeros_like(acc_ref)

    acc_ref[...] += jnp.dot(
        x_ref[...], w_ref[...], preferred_element_type=jnp.float32
    )

    @pl.when(pl.program_id(2) == pl.num_programs(2) - 1)
    def _store():
        o_ref[...] = (acc_ref[...] + b_ref[...]).astype(o_ref.dtype)


def normalized_model(x, mean, std, weight, bias, *, tm=128, tn=128, tk=2048):
    """Forward of NormalizedModel with the Normalize layer folded into the linear model.

    x: (N, C, H, W) f32; mean/std: (C,) f32; weight: (C*H*W, K); bias: (K,).
    Returns logits of shape (N, K).
    """
    n, c, h, w = x.shape
    chw = c * h * w
    k = weight.shape[1]
    f32 = jnp.float32

    # ---- Fold the per-channel Normalize into the classifier parameters. ----
    inv_std = 1.0 / std.astype(f32)                                     # (C,)
    scale_flat = jnp.broadcast_to(inv_std[:, None, None], (c, h, w)).reshape(chw)
    shift_flat = jnp.broadcast_to(
        (mean.astype(f32) * inv_std)[:, None, None], (c, h, w)
    ).reshape(chw)
    w_eff = weight.astype(f32) * scale_flat[:, None]                    # (CHW, K)
    b_eff = bias.astype(f32) - shift_flat @ weight.astype(f32)          # (K,)
    # TODO(synk): for a non-linear downstream `model` the fold does not apply;
    # keep the normalize in-kernel as x * scale + shift (FMA) instead.

    # ---- Lane-dense 2-D input: flatten NCHW in the wrapper, not the kernel. ----
    x2 = x.reshape(n, chw).astype(f32)

    # ---- 128-granular tiles (safe on v5e, fine on v6e/v7x), clamped to problem. ----
    tm = min(tm, _round_up(n, 8))
    tn = min(tn, _round_up(k, 128))
    tk = min(tk, _round_up(chw, 128))

    n_p = _round_up(n, tm)
    k_p = _round_up(k, tn)
    chw_p = _round_up(chw, tk)

    x_p = jnp.pad(x2, ((0, n_p - n), (0, chw_p - chw)))
    w_p = jnp.pad(w_eff, ((0, chw_p - chw), (0, k_p - k)))
    b_p = jnp.pad(b_eff, (0, k_p - k)).reshape(1, k_p)

    grid = (n_p // tm, k_p // tn, chw_p // tk)

    out_p = pl.pallas_call(
        _fused_matmul_kernel,
        out_shape=jax.ShapeDtypeStruct((n_p, k_p), x.dtype),
        grid_spec=pltpu.PrefetchScalarGridSpec(
            num_scalar_prefetch=0,
            grid=grid,
            in_specs=[
                pl.BlockSpec((tm, tk), lambda i, j, kk: (i, kk)),   # x tile
                pl.BlockSpec((tk, tn), lambda i, j, kk: (kk, j)),   # weight tile
                pl.BlockSpec((1, tn), lambda i, j, kk: (0, j)),     # bias row
            ],
            out_specs=pl.BlockSpec((tm, tn), lambda i, j, kk: (i, j)),
            scratch_shapes=[pltpu.VMEM((tm, tn), jnp.float32)],
        ),
        compiler_params=pltpu.CompilerParams(
            dimension_semantics=("parallel", "parallel", "arbitrary"),
        ),
    )(x_p, w_p, b_p)

    # Slice away the zero-padded rows/columns so padding never leaks.
    return out_p[:n, :k]


if __name__ == "__main__":
    # Small deterministic example: batch=2, channels=4, spatial=16x16, K=10 classes.
    N, C, H, W, K = 2, 4, 16, 16, 10

    key = jax.random.PRNGKey(0)
    kx, kw, kb = jax.random.split(key, 3)

    x = jax.random.normal(kx, (N, C, H, W), dtype=jnp.float32)
    # ImageNet-style per-channel stats extended to C=4.
    mean = jnp.array([0.485, 0.456, 0.406, 0.450], dtype=jnp.float32)
    std = jnp.array([0.229, 0.224, 0.225, 0.226], dtype=jnp.float32)
    # Deterministic synthetic "model" parameters (linear classifier).
    weight = 0.02 * jax.random.normal(kw, (C * H * W, K), dtype=jnp.float32)
    bias = 0.01 * jax.random.normal(kb, (K,), dtype=jnp.float32)

    out = normalized_model(x, mean, std, weight, bias)
    out = jax.block_until_ready(out)

    # Pure-JAX reference of the *unfused* forward (normalize then linear model).
    xn_ref = (x - mean[None, :, None, None]) / std[None, :, None, None]
    ref = xn_ref.reshape(N, -1) @ weight + bias[None, :]
    assert jnp.allclose(out, ref, atol=1e-4, rtol=1e-4), "mismatch vs reference"

    print("KERNEL_OK")
</pallas_src>

<mosaic_0001>
module attributes {stable_mosaic.version = 11 : i64} {
  func.func @_fused_matmul_kernel(%arg0: i32, %arg1: i32, %arg2: i32, %arg3: memref<8x1024xf32, #tpu.memory_space<vmem>>, %arg4: memref<1024x128xf32, #tpu.memory_space<vmem>>, %arg5: memref<1x128xf32, #tpu.memory_space<vmem>>, %arg6: memref<8x128xf32, #tpu.memory_space<vmem>>, %arg7: memref<8x128xf32, #tpu.memory_space<vmem>>) attributes {dimension_semantics = [#tpu.dimension_semantics<parallel>, #tpu.dimension_semantics<parallel>, #tpu.dimension_semantics<arbitrary>], iteration_bounds = array<i64: 1, 1, 1>, scalar_prefetch = 0 : i64, scratch_operands = 1 : i64, tpu.core_type = #tpu.core_type<tc>, window_params = [{transform_indices = @transform_0, window_bounds = array<i64: 8, 1024>}, {transform_indices = @transform_1, window_bounds = array<i64: 1024, 128>}, {transform_indices = @transform_2, window_bounds = array<i64: 1, 128>}, {transform_indices = @transform_3, window_bounds = array<i64: 8, 128>}]} {
    %c0_i32 = arith.constant 0 : i32
    %0 = arith.cmpi eq, %arg2, %c0_i32 : i32
    %1 = arith.extui %0 : i1 to i32
    %c0_i32_0 = arith.constant 0 : i32
    %2 = arith.cmpi ne, %1, %c0_i32_0 : i32
    scf.if %2 {
      %cst_10 = arith.constant 0.000000e+00 : f32
      %12 = vector.broadcast %cst_10 : f32 to vector<8x128xf32>
      %c0_11 = arith.constant 0 : index
      %c0_12 = arith.constant 0 : index
      %13 = vector.load %arg7[%c0_11, %c0_12] : memref<8x128xf32, #tpu.memory_space<vmem>>, vector<8x128xf32>
      tpu.vector_store %arg7[%c0_11, %c0_12], %12 {strides = array<i32>} : memref<8x128xf32, #tpu.memory_space<vmem>>, vector<8x128xf32>,
    } else {
    }
    %c0 = arith.constant 0 : index
    %c0_1 = arith.constant 0 : index
    %3 = vector.load %arg7[%c0, %c0_1] : memref<8x128xf32, #tpu.memory_space<vmem>>, vector<8x128xf32>
    %c0_2 = arith.constant 0 : index
    %c0_3 = arith.constant 0 : index
    %4 = vector.load %arg3[%c0_2, %c0_3] : memref<8x1024xf32, #tpu.memory_space<vmem>>, vector<8x1024xf32>
    %c0_4 = arith.constant 0 : index
    %c0_5 = arith.constant 0 : index
    %5 = vector.load %arg4[%c0_4, %c0_5] : memref<1024x128xf32, #tpu.memory_space<vmem>>, vector<1024x128xf32>
    %cst = arith.constant dense<0.000000e+00> : vector<8x128xf32>
    %6 = tpu.matmul %4, %5, %cst {dimension_numbers = #tpu.dot_dimension_numbers<[1], [0], [0], [1], [0, 0, 1, 1], [], []>} : vector<8x1024xf32>, vector<1024x128xf32>, vector<8x128xf32> -> vector<8x128xf32>
    %7 = arith.addf %3, %6 : vector<8x128xf32>
    %c0_6 = arith.constant 0 : index
    %c0_7 = arith.constant 0 : index
    %8 = vector.load %arg7[%c0_6, %c0_7] : memref<8x128xf32, #tpu.memory_space<vmem>>, vector<8x128xf32>
    tpu.vector_store %arg7[%c0_6, %c0_7], %7 {strides = array<i32>} : memref<8x128xf32, #tpu.memory_space<vmem>>, vector<8x128xf32>,
    %c0_i32_8 = arith.constant 0 : i32
    %9 = arith.cmpi eq, %arg2, %c0_i32_8 : i32
    %10 = arith.extui %9 : i1 to i32
    %c0_i32_9 = arith.constant 0 : i32
    %11 = arith.cmpi ne, %10, %c0_i32_9 : i32
    scf.if %11 {
      %c0_10 = arith.constant 0 : index
      %c0_11 = arith.constant 0 : index
      %12 = vector.load %arg7[%c0_10, %c0_11] : memref<8x128xf32, #tpu.memory_space<vmem>>, vector<8x128xf32>
      %c0_12 = arith.constant 0 : index
      %c0_13 = arith.constant 0 : index
      %13 = vector.load %arg5[%c0_12, %c0_13] : memref<1x128xf32, #tpu.memory_space<vmem>>, vector<1x128xf32>
      %14 = vector.broadcast %13 : vector<1x128xf32> to vector<8x128xf32>
      %15 = arith.addf %12, %14 : vector<8x128xf32>
      %c0_14 = arith.constant 0 : index
      %c0_15 = arith.constant 0 : index
      %16 = vector.load %arg6[%c0_14, %c0_15] : memref<8x128xf32, #tpu.memory_space<vmem>>, vector<8x128xf32>
      tpu.vector_store %arg6[%c0_14, %c0_15], %15 {strides = array<i32>} : memref<8x128xf32, #tpu.memory_space<vmem>>, vector<8x128xf32>,
    } else {
    }
    return
  }
  func.func @transform_0(%arg0: i32, %arg1: i32, %arg2: i32) -> (i32, i32) {
    %c0_i32 = arith.constant 0 : i32
    return %arg0, %arg2 : i32, i32
  }
  func.func @transform_1(%arg0: i32, %arg1: i32, %arg2: i32) -> (i32, i32) {
    %c0_i32 = arith.constant 0 : i32
    return %arg2, %arg1 : i32, i32
  }
  func.func @transform_2(%arg0: i32, %arg1: i32, %arg2: i32) -> (i32, i32) {
    %c0_i32 = arith.constant 0 : i32
    %c0_i32_0 = arith.constant 0 : i32
    return %c0_i32, %arg1 : i32, i32
  }
  func.func @transform_3(%arg0: i32, %arg1: i32, %arg2: i32) -> (i32, i32) {
    %c0_i32 = arith.constant 0 : i32
    return %arg0, %arg1 : i32, i32
  }
}

</mosaic_0001>

<bundles_post_ra>
// kernel: tpu_custom_call.1
= control target key start
LH: loop header
LB: loop body
LE: loop exit
PB: predicated region body
PF: predicated region fallthrough
CT: control target
= control target key end

     0   :  { %8 = vsyncpa [#allocation4], 0  ;;  %s743_s0 = inlined_call_operand.hbm [shape: f32[8,1024], index: 0, kind: input, shape index: {}]   ;;  %s744_s1 = inlined_call_operand.hbm [shape: f32[1024,128], index: 1, kind: input, shape index: {}]   ;;  %s745_s2 = inlined_call_operand.vmem [shape: f32[1,128], index: 2, kind: input, shape index: {}]   ;;  %s746_s3 = inlined_call_operand.hbm [shape: f32[8,128], index: 3, kind: output, shape index: {}]  }
   0x1   :  { %9 = vsyncpa [#allocation7], 0 }
   0x2   :  { %10 = vsyncpa [#allocation5], 0  ;;  %s706_s12 = smov [#allocation3]   ;;  %s707_s14 = smov [#allocation6]  }
   0x3   :  { %s17_s13 = sshll.u32 %s706_s12, 4  ;;  %s26_s15 = sshll.u32 %s707_s14, 4  ;;  %s18_s13 = int_to_ptr.vmem [resolvable:$true] %s17_s13  ;;  %s27_s15 = int_to_ptr.vmem [resolvable:$true] %s26_s15 }
   0x4   :  { %s648_s16 = scalar_lea.vmem %s18_s13, 1024  ;;  %p653_p1 = scmp.lt.s32.totalorder %s18_s13, %s18_s13 }
   0x5   :  { %p649_p0 = scmp.ne.s32.totalorder %s18_s13, %s648_s16  ;;  %p654_p2 = scmp.lt.s32.totalorder %s648_s16, %s648_s16 }
   0x7   :  { %p655_p3 = por %p654_p2, %p653_p1 }
   0x9   :  { %p656_p4 = pnand %p655_p3, %p649_p0 }
   0xb   :  { %659 = shalt.err (!%p656_p4)
}
   0xc   :  { %20 = dma.hbm_to_vmem [thread:$0]  %s743_s0, 1024, %s18_s13, [#allocation4]  }
   0xd   :  { %s668_s19 = scalar_lea.vmem %s27_s15, 16384  ;;  %p673_p6 = scmp.lt.s32.totalorder %s27_s15, %s27_s15 }
   0xe   :  { %p669_p5 = scmp.ne.s32.totalorder %s27_s15, %s668_s19  ;;  %p674_p7 = scmp.lt.s32.totalorder %s668_s19, %s668_s19 }
  0x10   :  { %p675_p8 = por %p674_p7, %p673_p6 }
  0x12   :  { %p676_p9 = pnand %p675_p8, %p669_p5 }
  0x14   :  { %679 = shalt.err (!%p676_p9)
}
  0x15   :  { %s708_s20 = smov 128   ;;  %s709_s21 = smov 8  }
  0x16   :  { %32 = dma.hbm_to_vmem [thread:$0]  %s744_s1, 16384, %s27_s15, [#allocation7], %s708_s20, %s708_s20, %s709_s21  }
  0x17   :  { %700 = dma.done.wait [#allocation4], 1024  }
  0x18   :  { %701 = vsyncadd [#allocation4], 4294966272 }
  0x19   :  { %702 = dma.done.wait [#allocation7], 16384  }
  0x1a   :  { %703 = vsyncadd [#allocation7], 4294950912  ;;  %v86_v0 = vld [vmem:[#allocation6 + $0xf8] sm:$0xff]  ;;  %v85_v4 = vld [vmem:[#allocation6 + $0xf0] sm:$0xff]  ;;  %s710_s24 = smov [#allocation8]  }
  0x1b   :  { %v118_v1 = vld [vmem:[#allocation6 + $0x1f8] sm:$0xff]  ;;  %495 = vmatprep.subr.mxu0 %v86_v0  ;;  %v117_v5 = vld [vmem:[#allocation6 + $0x1f0] sm:$0xff]  ;;  %v84_v8 = vld [vmem:[#allocation6 + $0xe8] sm:$0xff]  ;;  %s484_s25 = sshll.u32 %s710_s24, 4  ;;  %s485_s25 = int_to_ptr.vmem [resolvable:$true] %s484_s25 }
  0x1c   :  { %v70_v2 = vld [vmem:[#allocation6 + $0x78] sm:$0xff]  ;;  %530 = vmatprep.subr.mxu1 %v118_v1  ;;  %v69_v6 = vld [vmem:[#allocation6 + $0x70] sm:$0xff]  ;;  %v116_v9 = vld [vmem:[#allocation6 + $0x1e8] sm:$0xff]  ;;  %s680_s26 = scalar_lea.vmem %s485_s25, 128  ;;  %p685_p11 = scmp.lt.s32.totalorder %s485_s25, %s485_s25 }
  0x1d   :  { %v102_v3 = vld [vmem:[#allocation6 + $0x178] sm:$0xff]  ;;  %496 = vmatpush3.msra.mxu0 %v70_v2  ;;  %v101_v7 = vld [vmem:[#allocation6 + $0x170] sm:$0xff]  ;;  %v68_v10 = vld [vmem:[#allocation6 + $0x68] sm:$0xff]  ;;  %p681_p10 = scmp.ne.s32.totalorder %s485_s25, %s680_s26  ;;  %p686_p12 = scmp.lt.s32.totalorder %s680_s26, %s680_s26 }
  0x1e   :  { %531 = vmatpush3.msra.mxu1 %v102_v3  ;;  %497 = vmatprep.subr.mxu0 %v85_v4  ;;  %v100_v11 = vld [vmem:[#allocation6 + $0x168] sm:$0xff]  ;;  %v83_v12 = vld [vmem:[#allocation6 + $0xe0] sm:$0xff]  ;;  %v82_v16 = vld [vmem:[#allocation6 + $0xd8] sm:$0xff] }
  0x1f   :  { %532 = vmatprep.subr.mxu1 %v117_v5  ;;  %498 = vmatpush3.msra.mxu0 %v69_v6  ;;  %v115_v13 = vld [vmem:[#allocation6 + $0x1e0] sm:$0xff]  ;;  %v114_v17 = vld [vmem:[#allocation6 + $0x1d8] sm:$0xff]  ;;  %v81_v20 = vld [vmem:[#allocation6 + $0xd0] sm:$0xff]  ;;  %p687_p13 = por %p686_p12, %p685_p11 }
  0x20   :  { %533 = vmatpush3.msra.mxu1 %v101_v7  ;;  %499 = vmatprep.subr.mxu0 %v84_v8  ;;  %v67_v14 = vld [vmem:[#allocation6 + $0x60] sm:$0xff]  ;;  %v66_v18 = vld [vmem:[#allocation6 + $0x58] sm:$0xff]  ;;  %v113_v21 = vld [vmem:[#allocation6 + $0x1d0] sm:$0xff] }
  0x21   :  { %534 = vmatprep.subr.mxu1 %v116_v9  ;;  %v99_v15 = vld [vmem:[#allocation6 + $0x160] sm:$0xff]  ;;  %500 = vmatpush3.msra.mxu0 %v68_v10  ;;  %v98_v19 = vld [vmem:[#allocation6 + $0x158] sm:$0xff]  ;;  %v65_v22 = vld [vmem:[#allocation6 + $0x50] sm:$0xff]  ;;  %p688_p0 = pnand %p687_p13, %p681_p10 }
  0x22   :  { %535 = vmatpush3.msra.mxu1 %v100_v11  ;;  %501 = vmatprep.subr.mxu0 %v83_v12  ;;  %v97_v23 = vld [vmem:[#allocation6 + $0x150] sm:$0xff]  ;;  %v80_v24 = vld [vmem:[#allocation6 + $0xc8] sm:$0xff]  ;;  %v79_v28 = vld [vmem:[#allocation6 + $0xc0] sm:$0xff] }
  0x23   :  { %536 = vmatprep.subr.mxu1 %v115_v13  ;;  %502 = vmatpush3.msra.mxu0 %v67_v14  ;;  %v112_v25 = vld [vmem:[#allocation6 + $0x1c8] sm:$0xff]  ;;  %v111_v29 = vld [vmem:[#allocation6 + $0x1c0] sm:$0xff]  ;;  %v78_v32 = vld [vmem:[#allocation6 + $0xb8] sm:$0xff] }
  0x24   :  { %537 = vmatpush3.msra.mxu1 %v99_v15  ;;  %503 = vmatprep.subr.mxu0 %v82_v16  ;;  %v64_v26 = vld [vmem:[#allocation6 + $0x48] sm:$0xff]  ;;  %v63_v30 = vld [vmem:[#allocation6 + $0x40] sm:$0xff]  ;;  %v110_v33 = vld [vmem:[#allocation6 + $0x1b8] sm:$0xff] }
  0x25   :  { %538 = vmatprep.subr.mxu1 %v114_v17  ;;  %504 = vmatpush3.msra.mxu0 %v66_v18  ;;  %v96_v27 = vld [vmem:[#allocation6 + $0x148] sm:$0xff]  ;;  %v95_v31 = vld [vmem:[#allocation6 + $0x140] sm:$0xff]  ;;  %v62_v34 = vld [vmem:[#allocation6 + $0x38] sm:$0xff] }
  0x26   :  { %539 = vmatpush3.msra.mxu1 %v98_v19  ;;  %505 = vmatprep.subr.mxu0 %v81_v20  ;;  %v94_v35 = vld [vmem:[#allocation6 + $0x138] sm:$0xff]  ;;  %v77_v36 = vld [vmem:[#allocation6 + $0xb0] sm:$0xff]  ;;  %v76_v40 = vld [vmem:[#allocation6 + $0xa8] sm:$0xff] }
  0x27   :  { %540 = vmatprep.subr.mxu1 %v113_v21  ;;  %506 = vmatpush3.msra.mxu0 %v65_v22  ;;  %v109_v37 = vld [vmem:[#allocation6 + $0x1b0] sm:$0xff]  ;;  %v108_v41 = vld [vmem:[#allocation6 + $0x1a8] sm:$0xff]  ;;  %v75_v44 = vld [vmem:[#allocation6 + $0xa0] sm:$0xff] }
  0x28   :  { %541 = vmatpush3.msra.mxu1 %v97_v23  ;;  %507 = vmatprep.subr.mxu0 %v80_v24  ;;  %v61_v38 = vld [vmem:[#allocation6 + $0x30] sm:$0xff]  ;;  %v60_v42 = vld [vmem:[#allocation6 + $0x28] sm:$0xff]  ;;  %v107_v45 = vld [vmem:[#allocation6 + $0x1a0] sm:$0xff] }
  0x29   :  { %542 = vmatprep.subr.mxu1 %v112_v25  ;;  %508 = vmatpush3.msra.mxu0 %v64_v26  ;;  %v93_v39 = vld [vmem:[#allocation6 + $0x130] sm:$0xff]  ;;  %v92_v43 = vld [vmem:[#allocation6 + $0x128] sm:$0xff]  ;;  %v59_v46 = vld [vmem:[#allocation6 + $0x20] sm:$0xff] }
  0x2a   :  { %543 = vmatpush3.msra.mxu1 %v96_v27  ;;  %509 = vmatprep.subr.mxu0 %v79_v28  ;;  %v91_v47 = vld [vmem:[#allocation6 + $0x120] sm:$0xff]  ;;  %v74_v48 = vld [vmem:[#allocation6 + $0x98] sm:$0xff]  ;;  %v73_v52 = vld [vmem:[#allocation6 + $0x90] sm:$0xff] }
  0x2b   :  { %544 = vmatprep.subr.mxu1 %v111_v29  ;;  %510 = vmatpush3.msra.mxu0 %v63_v30  ;;  %v106_v49 = vld [vmem:[#allocation6 + $0x198] sm:$0xff]  ;;  %v105_v53 = vld [vmem:[#allocation6 + $0x190] sm:$0xff]  ;;  %v72_v56 = vld [vmem:[#allocation6 + $0x88] sm:$0xff] }
  0x2c   :  { %545 = vmatpush3.msra.mxu1 %v95_v31  ;;  %511 = vmatprep.subr.mxu0 %v78_v32  ;;  %v58_v50 = vld [vmem:[#allocation6 + $0x18] sm:$0xff]  ;;  %v57_v54 = vld [vmem:[#allocation6 + $0x10] sm:$0xff]  ;;  %v104_v57 = vld [vmem:[#allocation6 + $0x188] sm:$0xff] }
  0x2d   :  { %546 = vmatprep.subr.mxu1 %v110_v33  ;;  %512 = vmatpush3.msra.mxu0 %v62_v34  ;;  %v90_v51 = vld [vmem:[#allocation6 + $0x118] sm:$0xff]  ;;  %v89_v55 = vld [vmem:[#allocation6 + $0x110] sm:$0xff]  ;;  %v56_v58 = vld [vmem:[#allocation6 + $0x8] sm:$0xff] }
  0x2e   :  { %547 = vmatpush3.msra.mxu1 %v94_v35  ;;  %513 = vmatprep.subr.mxu0 %v77_v36  ;;  %v88_v59 = vld [vmem:[#allocation6 + $0x108] sm:$0xff]  ;;  %v71_v60 = vld [vmem:[#allocation6 + $0x80] sm:$0xff]  ;;  %v50_v1 = vld [vmem:[#allocation3 + $0x18] sm:$0xff] }
  0x2f   :  { %548 = vmatprep.subr.mxu1 %v109_v37  ;;  %514 = vmatpush3.msra.mxu0 %v61_v38  ;;  %v103_v61 = vld [vmem:[#allocation6 + $0x180] sm:$0xff]  ;;  %v48_v63 = vld [vmem:[#allocation3 + $0x8] sm:$0xff]  ;;  %v49_v3 = vld [vmem:[#allocation3 + $0x10] sm:$0xff] }
  0x30   :  { %549 = vmatpush3.msra.mxu1 %v93_v39  ;;  %515 = vmatprep.subr.mxu0 %v76_v40  ;;  %v55_v62 = vld [vmem:[#allocation6] sm:$0xff]  ;;  %v150_v4 = vld [vmem:[#allocation6 + $0x2f8] sm:$0xff]  ;;  %v149_v8 = vld [vmem:[#allocation6 + $0x2f0] sm:$0xff] }
  0x31   :  { %550 = vmatprep.subr.mxu1 %v108_v41  ;;  %516 = vmatpush3.msra.mxu0 %v60_v42  ;;  %v87_v0 = vld [vmem:[#allocation6 + $0x100] sm:$0xff]  ;;  %v182_v5 = vld [vmem:[#allocation6 + $0x3f8] sm:$0xff]  ;;  %v181_v9 = vld [vmem:[#allocation6 + $0x3f0] sm:$0xff] }
  0x32   :  { %551 = vmatpush3.msra.mxu1 %v92_v43  ;;  %517 = vmatprep.subr.mxu0 %v75_v44  ;;  %v47_v2 = vld [vmem:[#allocation3] sm:$0xff]  ;;  %v134_v6 = vld [vmem:[#allocation6 + $0x278] sm:$0xff]  ;;  %v133_v10 = vld [vmem:[#allocation6 + $0x270] sm:$0xff] }
  0x33   :  { %552 = vmatprep.subr.mxu1 %v107_v45  ;;  %518 = vmatpush3.msra.mxu0 %v59_v46  ;;  %v166_v7 = vld [vmem:[#allocation6 + $0x378] sm:$0xff]  ;;  %v165_v11 = vld [vmem:[#allocation6 + $0x370] sm:$0xff]  ;;  %v148_v12 = vld [vmem:[#allocation6 + $0x2e8] sm:$0xff] }
  0x34   :  { %553 = vmatpush3.msra.mxu1 %v91_v47  ;;  %519 = vmatprep.subr.mxu0 %v74_v48  ;;  %v180_v13 = vld [vmem:[#allocation6 + $0x3e8] sm:$0xff]  ;;  %v147_v16 = vld [vmem:[#allocation6 + $0x2e0] sm:$0xff]  ;;  %v146_v20 = vld [vmem:[#allocation6 + $0x2d8] sm:$0xff] }
  0x35   :  { %554 = vmatprep.subr.mxu1 %v106_v49  ;;  %520 = vmatpush3.msra.mxu0 %v58_v50  ;;  %v132_v14 = vld [vmem:[#allocation6 + $0x268] sm:$0xff]  ;;  %v179_v17 = vld [vmem:[#allocation6 + $0x3e0] sm:$0xff]  ;;  %v178_v21 = vld [vmem:[#allocation6 + $0x3d8] sm:$0xff] }
  0x36   :  { %555 = vmatpush3.msra.mxu1 %v90_v51  ;;  %521 = vmatprep.subr.mxu0 %v73_v52  ;;  %v164_v15 = vld [vmem:[#allocation6 + $0x368] sm:$0xff]  ;;  %v131_v18 = vld [vmem:[#allocation6 + $0x260] sm:$0xff]  ;;  %v130_v22 = vld [vmem:[#allocation6 + $0x258] sm:$0xff] }
  0x37   :  { %556 = vmatprep.subr.mxu1 %v105_v53  ;;  %522 = vmatpush3.msra.mxu0 %v57_v54  ;;  %v163_v19 = vld [vmem:[#allocation6 + $0x360] sm:$0xff]  ;;  %v162_v23 = vld [vmem:[#allocation6 + $0x358] sm:$0xff]  ;;  %v145_v24 = vld [vmem:[#allocation6 + $0x2d0] sm:$0xff] }
  0x38   :  { %557 = vmatpush3.msra.mxu1 %v89_v55  ;;  %523 = vmatprep.subr.mxu0 %v72_v56  ;;  %v177_v25 = vld [vmem:[#allocation6 + $0x3d0] sm:$0xff]  ;;  %v144_v28 = vld [vmem:[#allocation6 + $0x2c8] sm:$0xff]  ;;  %v143_v32 = vld [vmem:[#allocation6 + $0x2c0] sm:$0xff] }
  0x39   :  { %558 = vmatprep.subr.mxu1 %v104_v57  ;;  %524 = vmatpush3.msra.mxu0 %v56_v58  ;;  %v129_v26 = vld [vmem:[#allocation6 + $0x250] sm:$0xff]  ;;  %v176_v29 = vld [vmem:[#allocation6 + $0x3c8] sm:$0xff]  ;;  %v175_v33 = vld [vmem:[#allocation6 + $0x3c0] sm:$0xff] }
  0x3a   :  { %559 = vmatpush3.msra.mxu1 %v88_v59  ;;  %525 = vmatprep.subr.mxu0 %v71_v60  ;;  %v161_v27 = vld [vmem:[#allocation6 + $0x350] sm:$0xff]  ;;  %v128_v30 = vld [vmem:[#allocation6 + $0x248] sm:$0xff]  ;;  %v127_v34 = vld [vmem:[#allocation6 + $0x240] sm:$0xff] }
  0x3b   :  { %560 = vmatprep.subr.mxu1 %v103_v61  ;;  %526 = vmatpush3.msra.mxu0 %v55_v62  ;;  %v160_v31 = vld [vmem:[#allocation6 + $0x348] sm:$0xff]  ;;  %v159_v35 = vld [vmem:[#allocation6 + $0x340] sm:$0xff]  ;;  %v142_v36 = vld [vmem:[#allocation6 + $0x2b8] sm:$0xff] }
  0x3c   :  { %247 = vmatprep.mubr.f32.mxu0 %v48_v63  ;;  %561 = vmatpush3.msra.mxu1 %v87_v0  ;;  %v174_v37 = vld [vmem:[#allocation6 + $0x3b8] sm:$0xff]  ;;  %v141_v40 = vld [vmem:[#allocation6 + $0x2b0] sm:$0xff]  ;;  %v140_v44 = vld [vmem:[#allocation6 + $0x2a8] sm:$0xff] }
  0x3d   :  { %317 = vmatprep.mubr.f32.mxu1 %v50_v1  ;;  %248 = vmatmul.mubr.f32.vlgmr.msra.gmra.mxu0 %v47_v2  ;;  %v126_v38 = vld [vmem:[#allocation6 + $0x238] sm:$0xff]  ;;  %v173_v41 = vld [vmem:[#allocation6 + $0x3b0] sm:$0xff]  ;;  %v172_v45 = vld [vmem:[#allocation6 + $0x3a8] sm:$0xff] }
  0x3e   :  { %318 = vmatmul.mubr.f32.vlgmr.msra.gmra.mxu1 %v49_v3  ;;  %565 = vmatprep.subr.mxu0 %v150_v4  ;;  %v158_v39 = vld [vmem:[#allocation6 + $0x338] sm:$0xff]  ;;  %v125_v42 = vld [vmem:[#allocation6 + $0x230] sm:$0xff]  ;;  %v124_v46 = vld [vmem:[#allocation6 + $0x228] sm:$0xff] }
  0x3f   :  { %600 = vmatprep.subr.mxu1 %v182_v5  ;;  %566 = vmatpush3.msra.mxu0 %v134_v6  ;;  %v157_v43 = vld [vmem:[#allocation6 + $0x330] sm:$0xff]  ;;  %v156_v47 = vld [vmem:[#allocation6 + $0x328] sm:$0xff]  ;;  %v139_v48 = vld [vmem:[#allocation6 + $0x2a0] sm:$0xff] }
  0x40   :  { %601 = vmatpush3.msra.mxu1 %v166_v7  ;;  %567 = vmatprep.subr.mxu0 %v149_v8  ;;  %v171_v49 = vld [vmem:[#allocation6 + $0x3a0] sm:$0xff]  ;;  %v138_v52 = vld [vmem:[#allocation6 + $0x298] sm:$0xff]  ;;  %v137_v56 = vld [vmem:[#allocation6 + $0x290] sm:$0xff] }
  0x41   :  { %602 = vmatprep.subr.mxu1 %v181_v9  ;;  %568 = vmatpush3.msra.mxu0 %v133_v10  ;;  %v123_v50 = vld [vmem:[#allocation6 + $0x220] sm:$0xff]  ;;  %v170_v53 = vld [vmem:[#allocation6 + $0x398] sm:$0xff]  ;;  %v169_v57 = vld [vmem:[#allocation6 + $0x390] sm:$0xff] }
  0x42   :  { %603 = vmatpush3.msra.mxu1 %v165_v11  ;;  %569 = vmatprep.subr.mxu0 %v148_v12  ;;  %v155_v51 = vld [vmem:[#allocation6 + $0x320] sm:$0xff]  ;;  %v122_v54 = vld [vmem:[#allocation6 + $0x218] sm:$0xff]  ;;  %v121_v58 = vld [vmem:[#allocation6 + $0x210] sm:$0xff] }
  0x43   :  { %604 = vmatprep.subr.mxu1 %v180_v13  ;;  %570 = vmatpush3.msra.mxu0 %v132_v14  ;;  %v154_v55 = vld [vmem:[#allocation6 + $0x318] sm:$0xff]  ;;  %v153_v59 = vld [vmem:[#allocation6 + $0x310] sm:$0xff]  ;;  %v136_v60 = vld [vmem:[#allocation6 + $0x288] sm:$0xff] }
  0x44   :  { %605 = vmatpush3.msra.mxu1 %v164_v15  ;;  %571 = vmatprep.subr.mxu0 %v147_v16  ;;  %v168_v61 = vld [vmem:[#allocation6 + $0x388] sm:$0xff]  ;;  %v135_v0 = vld [vmem:[#allocation6 + $0x280] sm:$0xff]  ;;  %v54_v5 = vld [vmem:[#allocation3 + $0x38] sm:$0xff] }
  0x45   :  { %606 = vmatprep.subr.mxu1 %v179_v17  ;;  %572 = vmatpush3.msra.mxu0 %v131_v18  ;;  %v120_v62 = vld [vmem:[#allocation6 + $0x208] sm:$0xff]  ;;  %v167_v1 = vld [vmem:[#allocation6 + $0x380] sm:$0xff]  ;;  %v53_v7 = vld [vmem:[#allocation3 + $0x30] sm:$0xff] }
  0x46   :  { %607 = vmatpush3.msra.mxu1 %v163_v19  ;;  %573 = vmatprep.subr.mxu0 %v146_v20  ;;  %v152_v63 = vld [vmem:[#allocation6 + $0x308] sm:$0xff]  ;;  %v119_v2 = vld [vmem:[#allocation6 + $0x200] sm:$0xff] }
  0x47   :  { %608 = vmatprep.subr.mxu1 %v178_v21  ;;  %574 = vmatpush3.msra.mxu0 %v130_v22  ;;  %v52_v3 = vld [vmem:[#allocation3 + $0x28] sm:$0xff]  ;;  %v151_v4 = vld [vmem:[#allocation6 + $0x300] sm:$0xff] }
  0x48   :  { %609 = vmatpush3.msra.mxu1 %v162_v23  ;;  %575 = vmatprep.subr.mxu0 %v145_v24  ;;  %v51_v6 = vld [vmem:[#allocation3 + $0x20] sm:$0xff] }
  0x49   :  { %610 = vmatprep.subr.mxu1 %v177_v25  ;;  %576 = vmatpush3.msra.mxu0 %v129_v26  ;;  %v494_v22 = vld [vmem:[%s745_s2] ss:$0 sm:$0xff] }
  0x4a   :  { %611 = vmatpush3.msra.mxu1 %v161_v27  ;;  %577 = vmatprep.subr.mxu0 %v144_v28 }
  0x4b   :  { %612 = vmatprep.subr.mxu1 %v176_v29  ;;  %578 = vmatpush3.msra.mxu0 %v128_v30 }
  0x4c   :  { %613 = vmatpush3.msra.mxu1 %v160_v31  ;;  %579 = vmatprep.subr.mxu0 %v143_v32 }
  0x4d   :  { %614 = vmatprep.subr.mxu1 %v175_v33  ;;  %580 = vmatpush3.msra.mxu0 %v127_v34 }
  0x4e   :  { %615 = vmatpush3.msra.mxu1 %v159_v35  ;;  %581 = vmatprep.subr.mxu0 %v142_v36 }
  0x4f   :  { %616 = vmatprep.subr.mxu1 %v174_v37  ;;  %582 = vmatpush3.msra.mxu0 %v126_v38 }
  0x50   :  { %617 = vmatpush3.msra.mxu1 %v158_v39  ;;  %583 = vmatprep.subr.mxu0 %v141_v40 }
  0x51   :  { %618 = vmatprep.subr.mxu1 %v173_v41  ;;  %584 = vmatpush3.msra.mxu0 %v125_v42 }
  0x52   :  { %619 = vmatpush3.msra.mxu1 %v157_v43  ;;  %585 = vmatprep.subr.mxu0 %v140_v44 }
  0x53   :  { %620 = vmatprep.subr.mxu1 %v172_v45  ;;  %586 = vmatpush3.msra.mxu0 %v124_v46 }
  0x54   :  { %621 = vmatpush3.msra.mxu1 %v156_v47  ;;  %587 = vmatprep.subr.mxu0 %v139_v48 }
  0x55   :  { %622 = vmatprep.subr.mxu1 %v171_v49  ;;  %588 = vmatpush3.msra.mxu0 %v123_v50 }
  0x56   :  { %623 = vmatpush3.msra.mxu1 %v155_v51  ;;  %589 = vmatprep.subr.mxu0 %v138_v52 }
  0x57   :  { %624 = vmatprep.subr.mxu1 %v170_v53  ;;  %590 = vmatpush3.msra.mxu0 %v122_v54 }
  0x58   :  { %625 = vmatpush3.msra.mxu1 %v154_v55  ;;  %591 = vmatprep.subr.mxu0 %v137_v56 }
  0x59   :  { %626 = vmatprep.subr.mxu1 %v169_v57  ;;  %592 = vmatpush3.msra.mxu0 %v121_v58 }
  0x5a   :  { %627 = vmatpush3.msra.mxu1 %v153_v59  ;;  %593 = vmatprep.subr.mxu0 %v136_v60 }
  0x5b   :  { %628 = vmatprep.subr.mxu1 %v168_v61  ;;  %594 = vmatpush3.msra.mxu0 %v120_v62 }
  0x5c   :  { %629 = vmatpush3.msra.mxu1 %v152_v63  ;;  %595 = vmatprep.subr.mxu0 %v135_v0 }
  0x5d   :  { %630 = vmatprep.subr.mxu1 %v167_v1  ;;  %596 = vmatpush3.msra.mxu0 %v119_v2 }
  0x5e   :  { %387 = vmatprep.mubr.f32.mxu0 %v52_v3  ;;  %631 = vmatpush3.msra.mxu1 %v151_v4 }
  0x5f   :  { %457 = vmatprep.mubr.f32.mxu1 %v54_v5  ;;  %388 = vmatmul.mubr.f32.vlgmr.msra.gmra.mxu0 %v51_v6 }
  0x60   :  { %458 = vmatmul.mubr.f32.vlgmr.msra.gmra.mxu1 %v53_v7 }
  0xfd   :  { %v527_v8 = vpop.f32.mrf.mxu0 }
  0xfe   :  { %v562_v9 = vpop.f32.mrf.mxu1 }
  0xff   :  { %v528_v10 = vpop.f32.mrf.mxu0 }
 0x100   :  { %v563_v11 = vpop.f32.mrf.mxu1  ;;  %v529_v12 = vadd.f32 %v528_v10, %v527_v8 }
 0x101   :  { %v564_v13 = vadd.f32 %v563_v11, %v562_v9 }
 0x103   :  { %v320_v18 = vadd.f32 %v564_v13, %v529_v12 }
 0x11f   :  { %v597_v14 = vpop.f32.mrf.mxu0 }
 0x120   :  { %v632_v15 = vpop.f32.mrf.mxu1 }
 0x121   :  { %v598_v16 = vpop.f32.mrf.mxu0 }
 0x122   :  { %v633_v17 = vpop.f32.mrf.mxu1  ;;  %v599_v19 = vadd.f32 %v598_v16, %v597_v14 }
 0x123   :  { %v634_v21 = vadd.f32 %v633_v17, %v632_v15 }
 0x124   :  { %v390_v20 = vadd.f32 %v599_v19, %v320_v18 }
 0x126   :  { %v460_v23 = vadd.f32 %v634_v21, %v390_v20 }
 0x128   :  { %v476_v24 = vadd.f32 %v494_v22, %v460_v23 }
 0x12a   :  { %477 = vst [vmem:[#allocation8] sm:$0xff] %v476_v24 }
 0x12b   :  { %691 = shalt.err (!%p688_p0)
}
 0x12c   :  { %487 = dma.vmem_to_hbm [thread:$0]  %s485_s25, 128, %s746_s3, [#allocation5]  }
 0x12d   :  { %704 = dma.done.wait [#allocation5], 128  }
 0x12e   :  { %705 = vsyncadd [#allocation5], 4294967168 }
 0x12f   :  { %491 = vsyncpa [#allocation4], 1 }
 0x130   :  { %492 = vsyncpa [#allocation7], 1 }
 0x131   :  { %493 = vsyncpa [#allocation5], 1 }

</bundles_post_ra>
